<compile_context>
chip_gen: v7x
topology: tpu7x:2x2x1
jax: 0.10.0
libtpu: 0.0.40
codegen_flags: <defaults>
</compile_context>

<pallas_src>
import functools
import math

import jax
import jax.numpy as jnp
from jax.experimental import pallas as pl
from jax.experimental.pallas import tpu as pltpu


def _attention_head_kernel(x_ref, w_ref, b_ref, mask_ref, o_ref, *,
                           dqp, dkp, inv_scale):
    # x_ref:    (bb, S, Din)        f32
    # w_ref:    (Din, dqp+dkp+dvp)  f32   (fused, lane-padded Wq|Wk|Wv)
    # b_ref:    (1,   dqp+dkp+dvp)  f32
    # mask_ref: (bb, 1, S)          int32 (1 == masked-out)
    # o_ref:    (bb, S, dvp)        f32

    # --- fused QKV projection: (bb, S, Din) @ (Din, Dtot), no reshape -------
    qkv = jax.lax.dot_general(
        x_ref[...], w_ref[...], (((2,), (0,)), ((), ())),
        preferred_element_type=jnp.float32) + b_ref[...]

    # lane-aligned slices; fold 1/sqrt(S) into q (multiply, not divide)
    q = qkv[..., :dqp] * jnp.float32(inv_scale)
    k = qkv[..., dqp:dqp + dkp]
    v = qkv[..., dqp + dkp:]

    # --- scores = q @ k^T (contract last dims, no explicit transpose) -------
    scores = jax.lax.dot_general(
        q, k, (((2,), (2,)), ((0,), (0,))),
        preferred_element_type=jnp.float32)              # (bb, S, S)

    # masked_fill_(mask, -1e9): SET masked entries (broadcast over queries)
    scores = jnp.where(mask_ref[...] != 0, jnp.float32(-1e9), scores)

    # --- numerically stable softmax over the last axis -----------------------
    scores = scores - jnp.max(scores, axis=-1, keepdims=True)
    p = jnp.exp(scores)
    attn = p * pl.reciprocal(jnp.sum(p, axis=-1, keepdims=True), approx=True)

    # --- context = attn @ v (lane-dense, padded last dim) --------------------
    ctx = jax.lax.dot_general(
        attn, v, (((2,), (1,)), ((0,), (0,))),
        preferred_element_type=jnp.float32)              # (bb, S, dvp)
    o_ref[...] = ctx.astype(o_ref.dtype)


def attention_head(x, wq, bq, wk, bk, wv, bv, mask_bool, *, batch_block=None):
    """x: [B,S,Din] f32; w*: [Din,Dout]; b*: [1,Dout]; mask_bool: [B,1,S] bool."""
    B, S, Din = x.shape
    Dq, Dk, Dv = wq.shape[1], wk.shape[1], wv.shape[1]

    # One grid step for the whole batch by default (single-TC v5e/v6e).
    # On v7x pass batch_block = B // 2 to keep a size-2 parallel axis (2 TCs).
    if batch_block is None:
        batch_block = B
    assert B % batch_block == 0, "batch must be divisible by batch_block"

    # Pad every projection's output dim up to a multiple of 128 lanes:
    # lane-aligned in-kernel slices, lane-dense output store, and QK^T is
    # unaffected because the padded lanes of q and k are exactly zero.
    def _ceil128(d):
        return ((d + 127) // 128) * 128

    Dqp, Dkp, Dvp = _ceil128(Dq), _ceil128(Dk), _ceil128(Dv)

    def _pad(w, b, dp):
        d = w.shape[1]
        return jnp.pad(w, ((0, 0), (0, dp - d))), jnp.pad(b, ((0, 0), (0, dp - d)))

    wq_p, bq_p = _pad(wq, bq, Dqp)
    wk_p, bk_p = _pad(wk, bk, Dkp)
    wv_p, bv_p = _pad(wv, bv, Dvp)

    # Fuse the three projections into one weight / bias.
    wqkv = jnp.concatenate([wq_p, wk_p, wv_p], axis=1)   # (Din, Dqp+Dkp+Dvp)
    bqkv = jnp.concatenate([bq_p, bk_p, bv_p], axis=1)   # (1,   Dqp+Dkp+Dvp)
    Dtot = Dqp + Dkp + Dvp

    mask_i32 = mask_bool.astype(jnp.int32)
    inv_scale = 1.0 / math.sqrt(float(S))      # query.size(1) ** 0.5 in torch

    kernel = functools.partial(
        _attention_head_kernel, dqp=Dqp, dkp=Dkp, inv_scale=inv_scale)

    out_padded = pl.pallas_call(
        kernel,
        out_shape=jax.ShapeDtypeStruct((B, S, Dvp), x.dtype),
        grid_spec=pltpu.PrefetchScalarGridSpec(
            num_scalar_prefetch=0,
            grid=(B // batch_block,),
            in_specs=[
                pl.BlockSpec((batch_block, S, Din), lambda b: (b, 0, 0)),  # x
                pl.BlockSpec((Din, Dtot), lambda b: (0, 0)),               # Wqkv
                pl.BlockSpec((1, Dtot), lambda b: (0, 0)),                 # bqkv
                pl.BlockSpec((batch_block, 1, S), lambda b: (b, 0, 0)),    # mask
            ],
            out_specs=pl.BlockSpec((batch_block, S, Dvp), lambda b: (b, 0, 0)),
        ),
        compiler_params=pltpu.CompilerParams(
            dimension_semantics=("parallel",)),
    )(x, wqkv, bqkv, mask_i32)

    return out_padded[:, :, :Dv]


def reference(x, wq, bq, wk, bk, wv, bv, mask_bool):
    q = x @ wq + bq
    k = x @ wk + bk
    v = x @ wv + bv
    scale = math.sqrt(float(q.shape[1]))
    scores = jnp.einsum("bqd,bkd->bqk", q, k) / scale
    scores = jnp.where(mask_bool, -1e9, scores)
    attn = jax.nn.softmax(scores, axis=-1)
    return jnp.einsum("bqk,bkd->bqd", attn, v)


if __name__ == "__main__":
    B, S, DIM_INP, DIM_Q, DIM_K = 2, 8, 32, 16, 16

    key = jax.random.PRNGKey(0)
    kx, kq, kk, kv, kbq, kbk, kbv, km = jax.random.split(key, 8)

    x = jax.random.normal(kx, (B, S, DIM_INP), dtype=jnp.float32)

    # PyTorch Linear stores W as [out, in]; generate in that convention then
    # transpose to [in, out] for the kernel.
    bound = 1.0 / math.sqrt(DIM_INP)
    wq_t = jax.random.uniform(kq, (DIM_Q, DIM_INP), jnp.float32, -bound, bound)
    wk_t = jax.random.uniform(kk, (DIM_K, DIM_INP), jnp.float32, -bound, bound)
    wv_t = jax.random.uniform(kv, (DIM_K, DIM_INP), jnp.float32, -bound, bound)
    bq = jax.random.uniform(kbq, (1, DIM_Q), jnp.float32, -bound, bound)
    bk = jax.random.uniform(kbk, (1, DIM_K), jnp.float32, -bound, bound)
    bv = jax.random.uniform(kbv, (1, DIM_K), jnp.float32, -bound, bound)
    wq, wk, wv = wq_t.T, wk_t.T, wv_t.T                 # [Din, Dout]

    # attention mask: True == masked-out position (like masked_fill_)
    mask_bool = jax.random.bernoulli(km, p=0.25, shape=(B, 1, S))
    mask_bool = mask_bool.at[:, :, 0].set(False)        # no fully-masked row

    out = attention_head(x, wq, bq, wk, bk, wv, bv, mask_bool)
    out = jax.block_until_ready(out)

    ref = reference(x, wq, bq, wk, bk, wv, bv, mask_bool)
    assert out.shape == (B, S, DIM_K)
    # tolerance loosened slightly for pl.reciprocal(approx=True) in softmax
    assert jnp.allclose(out, ref, atol=2e-3, rtol=2e-3)

    print("KERNEL_OK")
</pallas_src>

<mosaic_0001>
module attributes {stable_mosaic.version = 11 : i64} {
  func.func @_attention_head_kernel(%arg0: i32, %arg1: memref<2x8x32xf32, #tpu.memory_space<vmem>>, %arg2: memref<32x384xf32, #tpu.memory_space<vmem>>, %arg3: memref<1x384xf32, #tpu.memory_space<vmem>>, %arg4: memref<2x1x8xi32, #tpu.memory_space<vmem>>, %arg5: memref<2x8x128xf32, #tpu.memory_space<vmem>>) attributes {dimension_semantics = [#tpu.dimension_semantics<parallel>], iteration_bounds = array<i64: 1>, scalar_prefetch = 0 : i64, scratch_operands = 0 : i64, tpu.core_type = #tpu.core_type<tc>, window_params = [{transform_indices = @transform_0, window_bounds = array<i64: 2, 8, 32>}, {pipeline_mode = #tpu.pipeline_mode<synchronous>, transform_indices = @transform_1, window_bounds = array<i64: 32, 384>}, {pipeline_mode = #tpu.pipeline_mode<synchronous>, transform_indices = @transform_2, window_bounds = array<i64: 1, 384>}, {transform_indices = @transform_3, window_bounds = array<i64: 2, 1, 8>}, {transform_indices = @transform_4, window_bounds = array<i64: 2, 8, 128>}]} {
    %c0 = arith.constant 0 : index
    %c0_0 = arith.constant 0 : index
    %c0_1 = arith.constant 0 : index
    %0 = vector.load %arg1[%c0, %c0_0, %c0_1] : memref<2x8x32xf32, #tpu.memory_space<vmem>>, vector<2x8x32xf32>
    %c0_2 = arith.constant 0 : index
    %c0_3 = arith.constant 0 : index
    %1 = vector.load %arg2[%c0_2, %c0_3] : memref<32x384xf32, #tpu.memory_space<vmem>>, vector<32x384xf32>
    %cst = arith.constant dense<0.000000e+00> : vector<2x8x384xf32>
    %2 = tpu.matmul %0, %1, %cst {dimension_numbers = #tpu.dot_dimension_numbers<[2], [0], [0, 1], [1], [0, 0, 0, 1, 1, 1], [], []>} : vector<2x8x32xf32>, vector<32x384xf32>, vector<2x8x384xf32> -> vector<2x8x384xf32>
    %c0_4 = arith.constant 0 : index
    %c0_5 = arith.constant 0 : index
    %3 = vector.load %arg3[%c0_4, %c0_5] : memref<1x384xf32, #tpu.memory_space<vmem>>, vector<1x384xf32>
    %4 = vector.shape_cast %3 : vector<1x384xf32> to vector<1x1x384xf32>
    %5 = vector.broadcast %4 : vector<1x1x384xf32> to vector<2x8x384xf32>
    %6 = arith.addf %2, %5 : vector<2x8x384xf32>
    %7 = vector.extract_strided_slice %6 {offsets = [0, 0, 0], sizes = [2, 8, 128], strides = [1, 1, 1]} : vector<2x8x384xf32> to vector<2x8x128xf32>
    %cst_6 = arith.constant 0.353553385 : f32
    %8 = vector.broadcast %cst_6 : f32 to vector<2x8x128xf32>
    %9 = arith.mulf %7, %8 : vector<2x8x128xf32>
    %10 = vector.extract_strided_slice %6 {offsets = [0, 0, 128], sizes = [2, 8, 128], strides = [1, 1, 1]} : vector<2x8x384xf32> to vector<2x8x128xf32>
    %11 = vector.extract_strided_slice %6 {offsets = [0, 0, 256], sizes = [2, 8, 128], strides = [1, 1, 1]} : vector<2x8x384xf32> to vector<2x8x128xf32>
    %cst_7 = arith.constant dense<0.000000e+00> : vector<2x8x8xf32>
    %12 = tpu.matmul %9, %10, %cst_7 {dimension_numbers = #tpu.dot_dimension_numbers<[2], [2], [1], [1], [0, 0, 0, 1, 1, 1], [0], [0]>} : vector<2x8x128xf32>, vector<2x8x128xf32>, vector<2x8x8xf32> -> vector<2x8x8xf32>
    %c0_8 = arith.constant 0 : index
    %c0_9 = arith.constant 0 : index
    %c0_10 = arith.constant 0 : index
    %13 = vector.load %arg4[%c0_8, %c0_9, %c0_10] : memref<2x1x8xi32, #tpu.memory_space<vmem>>, vector<2x1x8xi32>
    %c0_i32 = arith.constant 0 : i32
    %14 = vector.broadcast %c0_i32 : i32 to vector<2x1x8xi32>
    %15 = arith.cmpi ne, %13, %14 : vector<2x1x8xi32>
    %cst_11 = arith.constant -1.000000e+09 : f32
    %16 = vector.shape_cast %15 : vector<2x1x8xi1> to vector<2x1x8xi1>
    %17 = vector.broadcast %16 : vector<2x1x8xi1> to vector<2x8x8xi1>
    %18 = vector.broadcast %cst_11 : f32 to vector<2x8x8xf32>
    %19 = arith.select %17, %18, %12 : vector<2x8x8xi1>, vector<2x8x8xf32>
    %cst_12 = arith.constant dense<0xFF800000> : vector<2x8xf32>
    %20 = vector.multi_reduction <maximumf>, %19, %cst_12 [2] : vector<2x8x8xf32> to vector<2x8xf32>
    %21 = vector.shape_cast %20 : vector<2x8xf32> to vector<2x8x1xf32>
    %22 = vector.broadcast %21 : vector<2x8x1xf32> to vector<2x8x8xf32>
    %23 = arith.subf %19, %22 : vector<2x8x8xf32>
    %24 = math.exp %23 : vector<2x8x8xf32>
    %cst_13 = arith.constant dense<0.000000e+00> : vector<2x8xf32>
    %25 = vector.multi_reduction <add>, %24, %cst_13 [2] : vector<2x8x8xf32> to vector<2x8xf32>
    %26 = vector.shape_cast %25 : vector<2x8xf32> to vector<2x8x1xf32>
    %27 = tpu.reciprocal %26 {approx = true} : vector<2x8x1xf32> -> vector<2x8x1xf32>
    %28 = vector.broadcast %27 : vector<2x8x1xf32> to vector<2x8x8xf32>
    %29 = arith.mulf %24, %28 : vector<2x8x8xf32>
    %cst_14 = arith.constant dense<0.000000e+00> : vector<2x8x128xf32>
    %30 = tpu.matmul %29, %11, %cst_14 {dimension_numbers = #tpu.dot_dimension_numbers<[2], [1], [1], [2], [0, 0, 0, 1, 1, 2], [0], [0]>} : vector<2x8x8xf32>, vector<2x8x128xf32>, vector<2x8x128xf32> -> vector<2x8x128xf32>
    %c0_15 = arith.constant 0 : index
    %c0_16 = arith.constant 0 : index
    %c0_17 = arith.constant 0 : index
    %31 = vector.load %arg5[%c0_15, %c0_16, %c0_17] : memref<2x8x128xf32, #tpu.memory_space<vmem>>, vector<2x8x128xf32>
    tpu.vector_store %arg5[%c0_15, %c0_16, %c0_17], %30 {strides = array<i32>} : memref<2x8x128xf32, #tpu.memory_space<vmem>>, vector<2x8x128xf32>,
    return
  }
  func.func @transform_0(%arg0: i32) -> (i32, i32, i32) {
    %c0_i32 = arith.constant 0 : i32
    %c0_i32_0 = arith.constant 0 : i32
    %c0_i32_1 = arith.constant 0 : i32
    return %arg0, %c0_i32, %c0_i32_0 : i32, i32, i32
  }
  func.func @transform_1(%arg0: i32) -> (i32, i32) {
    %c0_i32 = arith.constant 0 : i32
    %c0_i32_0 = arith.constant 0 : i32
    %c0_i32_1 = arith.constant 0 : i32
    return %c0_i32, %c0_i32_0 : i32, i32
  }
  func.func @transform_2(%arg0: i32) -> (i32, i32) {
    %c0_i32 = arith.constant 0 : i32
    %c0_i32_0 = arith.constant 0 : i32
    %c0_i32_1 = arith.constant 0 : i32
    return %c0_i32, %c0_i32_0 : i32, i32
  }
  func.func @transform_3(%arg0: i32) -> (i32, i32, i32) {
    %c0_i32 = arith.constant 0 : i32
    %c0_i32_0 = arith.constant 0 : i32
    %c0_i32_1 = arith.constant 0 : i32
    return %arg0, %c0_i32, %c0_i32_0 : i32, i32, i32
  }
  func.func @transform_4(%arg0: i32) -> (i32, i32, i32) {
    %c0_i32 = arith.constant 0 : i32
    %c0_i32_0 = arith.constant 0 : i32
    %c0_i32_1 = arith.constant 0 : i32
    return %arg0, %c0_i32, %c0_i32_0 : i32, i32, i32
  }
}

</mosaic_0001>

<bundles_post_ra>
// kernel: tpu_custom_call.1
= control target key start
LH: loop header
LB: loop body
LE: loop exit
PB: predicated region body
PF: predicated region fallthrough
CT: control target
= control target key end

     0   :  { %9 = vsyncpa [#allocation3], 0  ;;  %s852_s0 = inlined_call_operand.hbm [shape: f32[2,8,32], index: 0, kind: input, shape index: {}]   ;;  %s853_s1 = inlined_call_operand.hbm [shape: f32[32,384], index: 1, kind: input, shape index: {}]   ;;  %s854_s2 = inlined_call_operand.vmem [shape: f32[1,384], index: 2, kind: input, shape index: {}]   ;;  %s855_s3 = inlined_call_operand.vmem [shape: s32[2,1,8], index: 3, kind: input, shape index: {}]   ;;  %s856_s4 = inlined_call_operand.hbm [shape: f32[2,8,128], index: 4, kind: output, shape index: {}]  }
   0x1   :  { %10 = vsyncpa [#allocation6], 0 }
   0x2   :  { %11 = vsyncpa [#allocation4], 0  ;;  %s742_s15 = smov [#allocation2]   ;;  %s670_s19 = scalar_lea.hbm %s852_s0, 256 }
   0x3   :  { %s17_s16 = sshll.u32 %s742_s15, 4  ;;  %p671_p0 = scmp.ne.s32.totalorder %s852_s0, %s670_s19  ;;  %s18_s16 = int_to_ptr.vmem [resolvable:$true] %s17_s16 }
   0x4   :  { %p674_p1 = scmp.lt.u32.totalorder %s670_s19, %s852_s0 }
   0x6   :  { %p676_p2 = pnand %p674_p1, %p671_p0 }
   0x8   :  { %679 = shalt.err (!%p676_p2)
}
   0x9   :  { %s680_s24 = scalar_lea.vmem %s18_s16, 256  ;;  %p685_p4 = scmp.lt.s32.totalorder %s18_s16, %s18_s16 }
   0xa   :  { %p681_p3 = scmp.ne.s32.totalorder %s18_s16, %s680_s24  ;;  %p686_p5 = scmp.lt.s32.totalorder %s680_s24, %s680_s24 }
   0xc   :  { %p687_p6 = por %p686_p5, %p685_p4 }
   0xe   :  { %p688_p7 = pnand %p687_p6, %p681_p3 }
  0x10   :  { %691 = shalt.err (!%p688_p7)
}
  0x11   :  { %s743_s25 = smov 128   ;;  %s744_s26 = smov 8  }
  0x12   :  { %23 = dma.hbm_to_vmem [thread:$0]  %s852_s0, 256, %s18_s16, [#allocation3], %s743_s25, %s743_s25, %s744_s26  }
  0x13   :  { %s745_s29 = smov [#allocation5]   ;;  %s692_s7 = scalar_lea.hbm %s853_s1, 1536 }
  0x14   :  { %s29_s30 = sshll.u32 %s745_s29, 4  ;;  %p693_p8 = scmp.ne.s32.totalorder %s853_s1, %s692_s7  ;;  %s30_s30 = int_to_ptr.vmem [resolvable:$true] %s29_s30 }
  0x15   :  { %p696_p9 = scmp.lt.u32.totalorder %s692_s7, %s853_s1 }
  0x17   :  { %p698_p10 = pnand %p696_p9, %p693_p8 }
  0x19   :  { %701 = shalt.err (!%p698_p10)
}
  0x1a   :  { %s702_s12 = scalar_lea.vmem %s30_s30, 1536  ;;  %p707_p12 = scmp.lt.s32.totalorder %s30_s30, %s30_s30 }
  0x1b   :  { %p703_p11 = scmp.ne.s32.totalorder %s30_s30, %s702_s12  ;;  %p708_p13 = scmp.lt.s32.totalorder %s702_s12, %s702_s12 }
  0x1d   :  { %p709_p0 = por %p708_p13, %p707_p12 }
  0x1f   :  { %p710_p1 = pnand %p709_p0, %p703_p11 }
  0x21   :  { %713 = shalt.err (!%p710_p1)
}
  0x22   :  { %s746_s0 = smov 384   ;;  %s747_s13 = smov 24  }
  0x23   :  { %35 = dma.hbm_to_vmem [thread:$0]  %s853_s1, 1536, %s30_s30, [#allocation6], %s746_s0, %s746_s0, %s747_s13  }
  0x24   :  { %736 = dma.done.wait [#allocation3], 256  }
  0x25   :  { %737 = vsyncadd [#allocation3], 4294967040 }
  0x26   :  { %738 = dma.done.wait [#allocation6], 1536  }
  0x27   :  { %739 = vsyncadd [#allocation6], 4294965760  ;;  %v748_v0 = vmov 0.0   ;;  %v49_v1 = vld [vmem:[#allocation5 + $0x8] sm:$0xff]  ;;  %v52_v2 = vld [vmem:[#allocation5 + $0x20] sm:$0xff]  ;;  %vm77_vm0 = vcmask 261120   ;;  %v62_v21 = vlaneseq }
  0x28   :  { %148 = vmatprep.mubr.f32.mxu0 %v748_v0  ;;  %v48_v3 = vld [vmem:[#allocation5] sm:$0xff]  ;;  %v636_v4 = vpack.c.bf16 %v52_v2, %v49_v1  ;;  %v51_v5 = vld [vmem:[#allocation5 + $0x18] sm:$0xff]  ;;  %v58_v7 = vld [vmem:[#allocation5 + $0x50] sm:$0xff]  ;;  %vm749_vm1 = vmmov 0   ;;  %v750_v46 = vmov 0   ;;  %vm396_vm5 = vcmask 64512  }
  0x29   :  { %v55_v6 = vld [vmem:[#allocation5 + $0x38] sm:$0xff]  ;;  %v638_v8 = vpack.c.bf16 %v51_v5, %v48_v3  ;;  %v54_v10 = vld [vmem:[#allocation5 + $0x30] sm:$0xff]  ;;  %v57_v11 = vld [vmem:[#allocation5 + $0x48] sm:$0xff]  ;;  %v63_v22 = vshrl.u32 %v62_v21, 7 }
  0x2a   :  { %v640_v9 = vpack.c.bf16 %v58_v7, %v55_v6  ;;  %v46_v12 = vld [vmem:[#allocation2] sm:$0xff]  ;;  %637 = vmatprep.subr.bf16.mxu0 %v636_v4  ;;  %v53_v14 = vld [vmem:[#allocation5 + $0x28] sm:$0xff]  ;;  %v642_v15 = vpack.c.bf16 %v57_v11, %v54_v10  ;;  %v56_v17 = vld [vmem:[#allocation5 + $0x40] sm:$0xff] }
  0x2b   :  { %v50_v13 = vld [vmem:[#allocation5 + $0x10] sm:$0xff]  ;;  %613 = vmatprep.mubr.msk.f32.mxu1 %vm77_vm0, %v46_v12  ;;  %639 = vmatpush1.bf16.msra.mxu0 %v638_v8  ;;  %v59_v18 = vld [vmem:[#allocation5 + $0x58] sm:$0xff]  ;;  %v64_v23 = vsub.s32 0, %v63_v22  ;;  %v68_v25 = vsub.s32 1, %v63_v22  ;;  %v72_v27 = vsub.s32 2, %v63_v22 }
  0x2c   :  { %v644_v16 = vpack.c.bf16 %v53_v14, %v50_v13  ;;  %641 = vmatprep.subr.bf16.mxu0 %v640_v9  ;;  %v648_v19 = vpack.c.bf16 %v59_v18, %v56_v17  ;;  %v47_v20 = vld [vmem:[#allocation2 + $0x8] sm:$0xff]  ;;  %v60_v24 = vld [vmem:[%s854_s2] sm:$0x7] }
  0x2d   :  { %v65_v26 = vrot.slane %v60_v24, %v64_v23  ;;  %v69_v28 = vrot.slane %v60_v24, %v68_v25  ;;  %v73_v32 = vrot.slane %v60_v24, %v72_v27  ;;  %v378_v44 = vld [vmem:[%s855_s3] sm:$0x1]  ;;  %v379_v45 = vld [vmem:[%s855_s3 + $0x1] sm:$0x1]  ;;  %s751_s3 = smov [#allocation7]  }
  0x2e   :  { %645 = vmatprep.subr.bf16.mxu1 %v644_v16  ;;  %vm380_vm2 = vcmp.ne.s32.totalorder %v378_v44, 0  ;;  %vm381_vm3 = vcmp.ne.s32.totalorder %v379_v45, 0  ;;  %s572_s20 = sshll.u32 %s751_s3, 4  ;;  %s573_s20 = int_to_ptr.vmem [resolvable:$true] %s572_s20 }
  0x2f   :  { %647 = vmatpush3.bf16.msra.mxu1 %v644_v16  ;;  %643 = vmatpush1.bf16.msra.mxu0 %v642_v15  ;;  %v382_v47 = vsel %vm380_vm2, 1, %v750_v46  ;;  %v383_v49 = vsel %vm381_vm3, 1, %v750_v46  ;;  %s714_s21 = scalar_lea.vmem %s573_s20, 256  ;;  %p719_p3 = scmp.lt.s32.totalorder %s573_s20, %s573_s20 }
  0x30   :  { %649 = vmatprep.subr.bf16.mxu1 %v648_v19  ;;  %621 = vmatprep.subr.mxu0 %v748_v0  ;;  %v387_v48 = vrot.slane %v382_v47, %v64_v23  ;;  %v391_v50 = vrot.slane %v383_v49, %v64_v23  ;;  %p715_p2 = scmp.ne.s32.totalorder %s573_s20, %s714_s21  ;;  %p720_p4 = scmp.lt.s32.totalorder %s714_s21, %s714_s21 }
  0x32   :  { %585 = vmatmul.mubr.msk.f32.vlgmr.msra.gmra.mrb[0].mxu0 %vm77_vm0, %v46_v12  ;;  %vm392_vm4 = vcmp.eq.s32.totalorder %v387_v48, 1  ;;  %vm393_vm6 = vcmp.eq.s32.totalorder %v391_v50, 1  ;;  %p721_p5 = por %p720_p4, %p719_p3 }
  0x33   :  { %651 = vmatpush3.bf16.msra.mxu1 %v648_v19  ;;  %154 = vmatprep.mubr.f32.mxu0 %v748_v0 }
  0x34   :  { %616 = vmatprep.subr.mxu1 %v748_v0  ;;  %p722_p6 = pnand %p721_p5, %p715_p2 }
  0x36   :  { %614 = vmatmul.mubr.msk.f32.vlgmr.msra.gmra.mrb[0].mxu1 %vm77_vm0, %v47_v20  ;;  %586 = vmatmul.mubr.msk.f32.gmra.mrb[2].mxu0 %vm77_vm0, %v47_v20 }
  0x37   :  { %618 = vmatprep.mubr.msk.f32.mxu1 %vm749_vm1, %v748_v0  ;;  %623 = vmatprep.mubr.msk.f32.mxu0 %vm749_vm1, %v748_v0 }
 0x105   :  { %v150_v29 = vpop.f32.mrb[0].mxu0 }
 0x106   :  { %v151_v30 = vadd.f32 %v150_v29, %v65_v26  ;;  %v152_v31 = vpop.f32.mrb[1].mxu0 }
 0x107   :  { %v153_v33 = vadd.f32 %v152_v31, %v69_v28 }
 0x108   :  { %v236_v37 = vmul.f32 0.35355338, %v151_v30 }
 0x109   :  { %v615_v34 = vpop.f32.mrb[0].mxu1  ;;  %v156_v35 = vpop.f32.mrb[2].mxu0  ;;  %617 = vmatpush3.xpose.msra.mxu1 %v153_v33 }
 0x10a   :  { %v227_v36 = vpop.f32.mrb[1].mxu1  ;;  %v157_v38 = vadd.f32 %v156_v35, %v65_v26  ;;  %v158_v39 = vpop.f32.mrb[3].mxu0  ;;  %626 = vmatprep.subr.mxu1 %v748_v0  ;;  %v233_v42 = vadd.f32 %v615_v34, %v73_v32 }
 0x10b   :  { %v228_v40 = vadd.f32 %v227_v36, %v73_v32  ;;  %v159_v41 = vadd.f32 %v158_v39, %v69_v28 }
 0x10c   :  { %619 = vmatmul.mubr.f32.vlgmr.msra.gmra.mrb[2].mxu1 %v236_v37  ;;  %v237_v43 = vmul.f32 0.35355338, %v157_v38 }
 0x10d   :  { %622 = vmatpush3.xpose.msra.mxu0 %v159_v41  ;;  %627 = vmatpush3.msra.mxu1 %v228_v40 }
 0x10e   :  { %631 = vmatprep.subr.mxu0 %v748_v0  ;;  %628 = vmatprep.mubr.msk.f32.mxu1 %vm749_vm1, %v748_v0 }
 0x110   :  { %624 = vmatmul.mubr.f32.vlgmr.msra.gmra.mrb[4].mxu0 %v237_v43 }
 0x111   :  { %632 = vmatpush3.msra.mxu0 %v233_v42  ;;  %633 = vmatprep.mubr.msk.f32.mxu0 %vm749_vm1, %v748_v0 }
 0x1df   :  { %v304_v51 = vpop.f32.mrb[2].mxu1 }
 0x1e0   :  { %v394_v52 = vsel %vm392_vm4, -1e+09, %v304_v51  ;;  %v620_v53 = vpop.f32.mrb[3].mxu1 }
 0x1e1   :  { %v397_v54 = vsel %vm396_vm5, %v394_v52, -inf }
 0x1e2   :  { %398 = vmax.xlane.f32.xlu0 %v397_v54 }
 0x1e3   :  { %v374_v55 = vpop.f32.mrb[4].mxu0 }
 0x1e4   :  { %v395_v56 = vsel %vm393_vm6, -1e+09, %v374_v55  ;;  %v625_v57 = vpop.f32.mrb[5].mxu0 }
 0x1e5   :  { %v400_v58 = vsel %vm396_vm5, %v395_v56, -inf }
 0x1e6   :  { %401 = vmax.xlane.f32.xlu0 %v400_v58 }
 0x26f   :  { %v399_v59 = vpop.xlane.xlu0 %398 }
 0x270   :  { %v403_v60 = vsub.f32 %v394_v52, %v399_v59 }
 0x272   :  { %v405_v61 = vmul.f32 1.442695, %v403_v60 }
 0x273   :  { %v402_v62 = vpop.xlane.xlu0 %401 }
 0x274   :  { %662 = vpow2.f32 %v405_v61  ;;  %v404_v63 = vsub.f32 %v395_v56, %v402_v62 }
 0x276   :  { %v407_v0 = vmul.f32 1.442695, %v404_v63 }
 0x278   :  { %664 = vpow2.f32 %v407_v0 }
 0x27e   :  { %v663_v1 = vpop.eup %662 }
 0x27f   :  { %v409_v2 = vsel %vm396_vm5, %v663_v1, 0.0 }
 0x280   :  { %410 = vadd.xlane.f32.xlu1 %v409_v2 }
 0x282   :  { %v665_v3 = vpop.eup %664 }
 0x283   :  { %v412_v4 = vsel %vm396_vm5, %v665_v3, 0.0 }
 0x284   :  { %413 = vadd.xlane.f32.xlu1 %v412_v4 }
 0x30d   :  { %v411_v5 = vpop.xlane.xlu1 %410 }
 0x30e   :  { %666 = vrcp.f32 %v411_v5 }
 0x311   :  { %v414_v6 = vpop.xlane.xlu1 %413 }
 0x312   :  { %668 = vrcp.f32 %v414_v6 }
 0x318   :  { %v667_v7 = vpop.eup %666 }
 0x319   :  { %v417_v8 = vmul.f32 %v667_v7, %v663_v1 }
 0x31b   :  { %629 = vmatmul.mubr.msk.f32.vlgmr.msra.gmra.mrb[4].mxu1 %vm396_vm5, %v417_v8 }
 0x31c   :  { %v669_v9 = vpop.eup %668 }
 0x31d   :  { %v418_v10 = vmul.f32 %v669_v9, %v665_v3 }
 0x31f   :  { %634 = vmatmul.mubr.msk.f32.vlgmr.msra.gmra.mrb[6].mxu0 %vm396_vm5, %v418_v10 }
 0x3ee   :  { %v488_v11 = vpop.f32.mrb[4].mxu1 }
 0x3ef   :  { %565 = vst [vmem:[#allocation7] sm:$0xff] %v488_v11  ;;  %v630_v12 = vpop.f32.mrb[5].mxu1 }
 0x3f2   :  { %v561_v13 = vpop.f32.mrb[6].mxu0 }
 0x3f3   :  { %566 = vst [vmem:[#allocation7 + $0x8] sm:$0xff] %v561_v13  ;;  %v635_v14 = vpop.f32.mrb[7].mxu0 }
 0x3f4   :  { %725 = shalt.err (!%p722_p6)
}
 0x3f5   :  { %s726_s24 = scalar_lea.hbm %s856_s4, 256 }
 0x3f6   :  { %p727_p7 = scmp.ne.s32.totalorder %s856_s4, %s726_s24  ;;  %p730_p8 = scmp.lt.u32.totalorder %s726_s24, %s856_s4 }
 0x3f8   :  { %p732_p9 = pnand %p730_p8, %p727_p7 }
 0x3fa   :  { %735 = shalt.err (!%p732_p9)
}
 0x3fb   :  { %578 = dma.vmem_to_hbm [thread:$0]  %s573_s20, 256, %s856_s4, [#allocation4], %s743_s25, %s743_s25, %s744_s26  }
 0x3fc   :  { %740 = dma.done.wait [#allocation4], 256  }
 0x3fd   :  { %741 = vsyncadd [#allocation4], 4294967040 }
 0x3fe   :  { %582 = vsyncpa [#allocation3], 1 }
 0x3ff   :  { %583 = vsyncpa [#allocation6], 1 }
 0x400   :  { %584 = vsyncpa [#allocation4], 1 }

</bundles_post_ra>
